<compile_context>
chip_gen: v7x
topology: tpu7x:2x2x1
jax: 0.10.0
libtpu: 0.0.40
codegen_flags: <defaults>
</compile_context>

<pallas_src>
import functools

import jax
import jax.numpy as jnp
from jax.experimental import pallas as pl
from jax.experimental.pallas import tpu as pltpu

LATENT = 64
HIDDEN = LATENT // 2  # 32
BN_EPS = 1e-5


def _round_up(n, m):
    return (n + m - 1) // m * m


def _vmem_limit_bytes():
    """Per-generation VMEM budget (v7x: 64 MiB physical; v5e/v6e: 128 MiB)."""
    cap = 64 * 1024 * 1024  # conservative fallback (v7x physical)
    try:
        info = pltpu.get_tpu_info()
        for name in ("vmem_capacity_bytes", "vmem_size_bytes", "vmem_bytes"):
            val = getattr(info, name, None)
            if val:
                cap = int(val)
                break
    except Exception:
        pass
    return int(min(cap * 3 // 4, 112 * 1024 * 1024))


def costnet_kernel(nrows_ref, x_ref, w1_ref, p_ref, out_ref,
                   hstash_ref, sum_ref, sq_ref, st_ref, *, use_stash):
    """Grid = (phase, batch_tile).  phase 0: BN stats (+ h stash), phase 1: apply.

    nrows_ref : SMEM (1,) int32        true batch size (tail mask + 1/N)
    x_ref     : VMEM (TB, 64)  f32     input tile
    w1_ref    : VMEM (64, 32)  f32     fc1 weight, pre-transposed (resident)
    p_ref     : VMEM (4, 32)   f32     [gamma; beta; w2; b2-broadcast] (resident)
    out_ref   : VMEM (1, 1, TB) f32    lane-dense sigmoid output row
    hstash_ref: VMEM (ntiles, TB, 32) bf16  persistent h stash (phase0 -> phase1)
    sum_ref/sq_ref : VMEM (1, 32) f32  global batch sum / sum-of-squares
    st_ref    : VMEM (2, 32) f32       fused BN scale / shift
    """
    phase = pl.program_id(0)
    tile = pl.program_id(1)
    ntiles = pl.num_programs(1)
    tb = x_ref.shape[0]

    # ---------------- phase 0: global batch statistics (+ h stash) ----------
    @pl.when(phase == 0)
    def _stats():
        @pl.when(tile == 0)
        def _init():
            sum_ref[...] = jnp.zeros_like(sum_ref)
            sq_ref[...] = jnp.zeros_like(sq_ref)

        # fc[0]: Linear(64 -> 32), f32 on the MXU (fc1 bias dropped: exactly
        # cancelled by train-mode BatchNorm's mean subtraction).
        h = jnp.dot(x_ref[...], w1_ref[...],
                    preferred_element_type=jnp.float32)              # (TB, 32)
        if use_stash:
            hstash_ref[tile] = h.astype(jnp.bfloat16)

        # Partial-block tail mask: rows >= true batch size contribute nothing.
        rows = tile * tb + jax.lax.broadcasted_iota(jnp.int32, (tb, 1), 0)
        hm = jnp.where(rows < nrows_ref[0], h, 0.0)
        sum_ref[...] += jnp.sum(hm, axis=0, keepdims=True)            # (1, 32)
        sq_ref[...] += jnp.sum(hm * hm, axis=0, keepdims=True)        # (1, 32)

        @pl.when(tile == ntiles - 1)
        def _finalize():
            inv_n = 1.0 / nrows_ref[0].astype(jnp.float32)
            mean = sum_ref[...] * inv_n
            # Biased variance (divide by N), as PyTorch uses for normalization.
            # TODO(synk): compensated / pivoted accumulation if |mean| >> std.
            var = jnp.maximum(sq_ref[...] * inv_n - mean * mean, 0.0)
            s = p_ref[0:1, :] * jax.lax.rsqrt(var + BN_EPS)           # gamma*rsqrt
            st_ref[0:1, :] = s
            st_ref[1:2, :] = p_ref[1:2, :] - mean * s                 # beta - mean*s

    # ---------------- phase 1: fused BN affine + ReLU + fc2 + sigmoid -------
    @pl.when(phase == 1)
    def _apply():
        if use_stash:
            h = hstash_ref[tile].astype(jnp.float32)                  # (TB, 32)
        else:
            h = jnp.dot(x_ref[...], w1_ref[...],
                        preferred_element_type=jnp.float32)
        hr = jnp.maximum(h * st_ref[0:1, :] + st_ref[1:2, :], 0.0)    # (TB, 32)
        # fc[3]: Linear(32 -> 1), lane-dense as (1, TB): contract w2 (1,32)
        # against hr (TB,32) on the 32-dim (MXU is otherwise idle here).
        z = jax.lax.dot_general(p_ref[2:3, :], hr,
                                (((1,), (1,)), ((), ())),
                                preferred_element_type=jnp.float32)   # (1, TB)
        z = z + p_ref[3:4, 0:1]
        # fc[4]: Sigmoid as 0.5*(tanh(z/2)+1): tanh runs on the EUP.
        out_ref[...] = (0.5 * (jnp.tanh(0.5 * z) + 1.0)).reshape(out_ref.shape)


def costnet_forward(x, params, *, tile_rows=8192, use_stash=None):
    """x: (B, 64) float32.  Returns (B, 1) float32 sigmoid scores."""
    w1, b1, gamma, beta, w2, b2 = params   # b1 unused: cancelled by train-mode BN
    del b1
    B = x.shape[0]
    if x.dtype != jnp.float32:
        x = x.astype(jnp.float32)          # no wrapper bf16 pass; x read once as f32

    # Batch tile: multiple of 8 (sublane).  No wrapper jnp.pad: the tail is a
    # partial block, masked in-kernel using the true B (SMEM scalar prefetch).
    TB = _round_up(min(tile_rows, max(B, 1)), 8)
    ntiles = -(-B // TB)

    vmem_limit = _vmem_limit_bytes()
    # h-stash cost: the (TB, 32) bf16 slab is lane-padded to (TB, 128) in VMEM.
    # TODO(synk): store the stash transposed (32, TB) for dense 64 B/row (4x
    # larger batches before falling back to the x re-read path).
    stash_bytes = ntiles * TB * 128 * 2
    fixed_bytes = (2 * TB * LATENT * 4      # double-buffered f32 x tile
                   + 2 * 8 * TB * 4         # double-buffered (1,1,TB) out block
                   + (4 << 20))             # W1/params/sums + compiler slack
    if use_stash is None:
        use_stash = stash_bytes + fixed_bytes <= vmem_limit

    w1_t = jnp.transpose(w1).astype(jnp.float32)                      # (64, 32)
    # Packed resident per-feature params: gamma / beta / w2 / b2-broadcast.
    pvec = jnp.concatenate(
        [gamma.reshape(1, HIDDEN).astype(jnp.float32),
         beta.reshape(1, HIDDEN).astype(jnp.float32),
         w2.reshape(1, HIDDEN).astype(jnp.float32),
         jnp.broadcast_to(b2.reshape(1, 1).astype(jnp.float32), (1, HIDDEN))],
        axis=0)                                                       # (4, 32)
    nrows = jnp.array([B], dtype=jnp.int32)

    if use_stash:
        # phase 0: stream tile i; phase 1: stay on the last-fetched block so
        # no x DMA at all happens during the apply pass.
        x_map = lambda p, i, n: (i * (1 - p) + (ntiles - 1) * p, 0)
        stash_shape = (ntiles, TB, HIDDEN)
    else:
        x_map = lambda p, i, n: (i, 0)     # fallback: re-read x in phase 1
        stash_shape = (1, 8, HIDDEN)       # dummy (unused)

    out = pl.pallas_call(
        functools.partial(costnet_kernel, use_stash=use_stash),
        out_shape=jax.ShapeDtypeStruct((ntiles, 1, TB), jnp.float32),
        grid_spec=pltpu.PrefetchScalarGridSpec(
            num_scalar_prefetch=1,
            grid=(2, ntiles),                       # (phase, batch tile)
            in_specs=[
                pl.BlockSpec((TB, LATENT), x_map),                       # x tile
                pl.BlockSpec((LATENT, HIDDEN), lambda p, i, n: (0, 0)),  # W1
                pl.BlockSpec((4, HIDDEN), lambda p, i, n: (0, 0)),       # params
            ],
            # Lane-dense output; constant block during phase 0 (never written
            # nor DMA'd back in the stats pass).
            out_specs=pl.BlockSpec((1, 1, TB), lambda p, i, n: (p * i, 0, 0)),
            scratch_shapes=[
                pltpu.VMEM(stash_shape, jnp.bfloat16),   # h stash
                pltpu.VMEM((1, HIDDEN), jnp.float32),    # sum(h)
                pltpu.VMEM((1, HIDDEN), jnp.float32),    # sum(h^2)
                pltpu.VMEM((2, HIDDEN), jnp.float32),    # fused BN scale/shift
            ],
        ),
        compiler_params=pltpu.CompilerParams(
            # Both axes sequential: the tile axis carries the global BN
            # accumulation and phase 0 must finish before phase 1.
            # TODO(synk): v7x megacore — split into a stats call plus a
            # "parallel" apply call (per-core partial sums) to use both TCs.
            dimension_semantics=("arbitrary", "arbitrary"),
            vmem_limit_bytes=vmem_limit,
        ),
    )(nrows, x, w1_t, pvec)

    return out.reshape(ntiles * TB, 1)[:B]


def init_params(key):
    """Deterministic parameter init matching the PyTorch module's shapes."""
    k1, k2, k3, k4 = jax.random.split(key, 4)
    bound1 = 1.0 / jnp.sqrt(LATENT)
    w1 = jax.random.uniform(k1, (HIDDEN, LATENT), jnp.float32, -bound1, bound1)
    b1 = jax.random.uniform(k2, (1, HIDDEN), jnp.float32, -bound1, bound1)
    gamma = jnp.ones((1, HIDDEN), jnp.float32)
    beta = jnp.zeros((1, HIDDEN), jnp.float32)
    bound2 = 1.0 / jnp.sqrt(HIDDEN)
    w2 = jax.random.uniform(k3, (1, HIDDEN), jnp.float32, -bound2, bound2)
    b2 = jax.random.uniform(k4, (1, 1), jnp.float32, -bound2, bound2)
    return (w1, b1, gamma, beta, w2, b2)


def reference_forward(x, params):
    """Plain-JAX f32 reference of the PyTorch module (train-mode BatchNorm);
    includes the fc1 bias, which the BN mean subtraction cancels exactly."""
    w1, b1, gamma, beta, w2, b2 = params
    h = jnp.dot(x, w1.T, preferred_element_type=jnp.float32) + b1
    mean = jnp.mean(h, axis=0, keepdims=True)
    var = jnp.mean((h - mean) ** 2, axis=0, keepdims=True)
    hn = (h - mean) * jax.lax.rsqrt(var + BN_EPS) * gamma + beta
    hr = jnp.maximum(hn, 0.0)
    z = hr @ w2.T + b2
    return jax.nn.sigmoid(z)


if __name__ == "__main__":
    key = jax.random.PRNGKey(0)
    k_x, k_x2, k_p = jax.random.split(key, 3)
    params = init_params(k_p)

    # Single-tile case (stash path, exact block).
    B = 16
    x = jax.random.normal(k_x, (B, LATENT), jnp.float32)
    out = jax.block_until_ready(costnet_forward(x, params))
    ref = reference_forward(x, params)
    assert out.shape == (B, 1)
    assert jnp.allclose(out, ref, atol=2e-3, rtol=2e-3), (out, ref)

    # Multi-tile with a partial (masked) last tile; global BN stats across tiles.
    B2 = 40
    x2 = jax.random.normal(k_x2, (B2, LATENT), jnp.float32)
    ref2 = reference_forward(x2, params)
    out2 = jax.block_until_ready(costnet_forward(x2, params, tile_rows=16))
    assert out2.shape == (B2, 1)
    assert jnp.allclose(out2, ref2, atol=2e-3, rtol=2e-3), (out2, ref2)

    # Same, forcing the no-stash fallback path (x re-read in phase 1).
    out3 = jax.block_until_ready(
        costnet_forward(x2, params, tile_rows=16, use_stash=False))
    assert out3.shape == (B2, 1)
    assert jnp.allclose(out3, ref2, atol=2e-3, rtol=2e-3), (out3, ref2)

    print("KERNEL_OK")
</pallas_src>

<mosaic_0001>
module attributes {stable_mosaic.version = 11 : i64} {
  func.func @costnet_kernel(%arg0: i32, %arg1: i32, %arg2: memref<1xi32, #tpu.memory_space<smem>>, %arg3: memref<16x64xf32, #tpu.memory_space<vmem>>, %arg4: memref<64x32xf32, #tpu.memory_space<vmem>>, %arg5: memref<4x32xf32, #tpu.memory_space<vmem>>, %arg6: memref<1x1x16xf32, #tpu.memory_space<vmem>>, %arg7: memref<1x16x32xbf16, #tpu.memory_space<vmem>>, %arg8: memref<1x32xf32, #tpu.memory_space<vmem>>, %arg9: memref<1x32xf32, #tpu.memory_space<vmem>>, %arg10: memref<2x32xf32, #tpu.memory_space<vmem>>) attributes {dimension_semantics = [#tpu.dimension_semantics<arbitrary>, #tpu.dimension_semantics<arbitrary>], iteration_bounds = array<i64: 2, 1>, scalar_prefetch = 1 : i64, scratch_operands = 4 : i64, tpu.core_type = #tpu.core_type<tc>, window_params = [{transform_indices = @transform_0, window_bounds = array<i64: 16, 64>}, {pipeline_mode = #tpu.pipeline_mode<synchronous>, transform_indices = @transform_1, window_bounds = array<i64: 64, 32>}, {pipeline_mode = #tpu.pipeline_mode<synchronous>, transform_indices = @transform_2, window_bounds = array<i64: 4, 32>}, {transform_indices = @transform_3, window_bounds = array<i64: 1, 1, 16>}]} {
    %c0_i32 = arith.constant 0 : i32
    %0 = arith.cmpi eq, %arg0, %c0_i32 : i32
    %1 = arith.extui %0 : i1 to i32
    %c0_i32_0 = arith.constant 0 : i32
    %2 = arith.cmpi ne, %1, %c0_i32_0 : i32
    scf.if %2 {
      %c0_i32_2 = arith.constant 0 : i32
      %6 = arith.cmpi eq, %arg1, %c0_i32_2 : i32
      %7 = arith.extui %6 : i1 to i32
      %c0_i32_3 = arith.constant 0 : i32
      %8 = arith.cmpi ne, %7, %c0_i32_3 : i32
      scf.if %8 {
        %cst_23 = arith.constant 0.000000e+00 : f32
        %42 = vector.broadcast %cst_23 : f32 to vector<1x32xf32>
        %c0_24 = arith.constant 0 : index
        %c0_25 = arith.constant 0 : index
        %43 = vector.load %arg8[%c0_24, %c0_25] : memref<1x32xf32, #tpu.memory_space<vmem>>, vector<1x32xf32>
        tpu.vector_store %arg8[%c0_24, %c0_25], %42 {strides = array<i32>} : memref<1x32xf32, #tpu.memory_space<vmem>>, vector<1x32xf32>,
        %cst_26 = arith.constant 0.000000e+00 : f32
        %44 = vector.broadcast %cst_26 : f32 to vector<1x32xf32>
        %c0_27 = arith.constant 0 : index
        %c0_28 = arith.constant 0 : index
        %45 = vector.load %arg9[%c0_27, %c0_28] : memref<1x32xf32, #tpu.memory_space<vmem>>, vector<1x32xf32>
        tpu.vector_store %arg9[%c0_27, %c0_28], %44 {strides = array<i32>} : memref<1x32xf32, #tpu.memory_space<vmem>>, vector<1x32xf32>,
      } else {
      }
      %c0 = arith.constant 0 : index
      %c0_4 = arith.constant 0 : index
      %9 = vector.load %arg3[%c0, %c0_4] : memref<16x64xf32, #tpu.memory_space<vmem>>, vector<16x64xf32>
      %c0_5 = arith.constant 0 : index
      %c0_6 = arith.constant 0 : index
      %10 = vector.load %arg4[%c0_5, %c0_6] : memref<64x32xf32, #tpu.memory_space<vmem>>, vector<64x32xf32>
      %cst = arith.constant dense<0.000000e+00> : vector<16x32xf32>
      %11 = tpu.matmul %9, %10, %cst {dimension_numbers = #tpu.dot_dimension_numbers<[1], [0], [0], [1], [0, 0, 1, 1], [], []>} : vector<16x64xf32>, vector<64x32xf32>, vector<16x32xf32> -> vector<16x32xf32>
      %12 = arith.truncf %11 : vector<16x32xf32> to vector<16x32xbf16>
      %13 = arith.index_cast %arg1 : i32 to index
      %c0_7 = arith.constant 0 : index
      %c0_8 = arith.constant 0 : index
      %14 = vector.load %arg7[%13, %c0_7, %c0_8] : memref<1x16x32xbf16, #tpu.memory_space<vmem>>, vector<1x16x32xbf16>
      %15 = vector.shape_cast %14 : vector<1x16x32xbf16> to vector<16x32xbf16>
      %16 = vector.shape_cast %12 : vector<16x32xbf16> to vector<1x16x32xbf16>
      tpu.vector_store %arg7[%13, %c0_7, %c0_8], %16 {strides = array<i32>} : memref<1x16x32xbf16, #tpu.memory_space<vmem>>, vector<1x16x32xbf16>,
      %c16_i32 = arith.constant 16 : i32
      %17 = arith.muli %arg1, %c16_i32 : i32
      %18 = tpu.iota {dimensions = array<i32: 0>} : vector<16x1xi32>
      %19 = vector.broadcast %17 : i32 to vector<16x1xi32>
      %20 = arith.addi %19, %18 : vector<16x1xi32>
      %c0_9 = arith.constant 0 : index
      %21 = memref.load %arg2[%c0_9] : memref<1xi32, #tpu.memory_space<smem>>
      %22 = vector.broadcast %21 : i32 to vector<16x1xi32>
      %23 = arith.cmpi slt, %20, %22 : vector<16x1xi32>
      %cst_10 = arith.constant 0.000000e+00 : f32
      %24 = vector.shape_cast %23 : vector<16x1xi1> to vector<16x1xi1>
      %25 = vector.broadcast %24 : vector<16x1xi1> to vector<16x32xi1>
      %26 = vector.broadcast %cst_10 : f32 to vector<16x32xf32>
      %27 = arith.select %25, %11, %26 : vector<16x32xi1>, vector<16x32xf32>
      %c0_11 = arith.constant 0 : index
      %c0_12 = arith.constant 0 : index
      %28 = vector.load %arg8[%c0_11, %c0_12] : memref<1x32xf32, #tpu.memory_space<vmem>>, vector<1x32xf32>
      %cst_13 = arith.constant dense<0.000000e+00> : vector<32xf32>
      %29 = vector.multi_reduction <add>, %27, %cst_13 [0] : vector<16x32xf32> to vector<32xf32>
      %30 = vector.shape_cast %29 : vector<32xf32> to vector<1x32xf32>
      %31 = arith.addf %28, %30 : vector<1x32xf32>
      %c0_14 = arith.constant 0 : index
      %c0_15 = arith.constant 0 : index
      %32 = vector.load %arg8[%c0_14, %c0_15] : memref<1x32xf32, #tpu.memory_space<vmem>>, vector<1x32xf32>
      tpu.vector_store %arg8[%c0_14, %c0_15], %31 {strides = array<i32>} : memref<1x32xf32, #tpu.memory_space<vmem>>, vector<1x32xf32>,
      %c0_16 = arith.constant 0 : index
      %c0_17 = arith.constant 0 : index
      %33 = vector.load %arg9[%c0_16, %c0_17] : memref<1x32xf32, #tpu.memory_space<vmem>>, vector<1x32xf32>
      %34 = arith.mulf %27, %27 : vector<16x32xf32>
      %cst_18 = arith.constant dense<0.000000e+00> : vector<32xf32>
      %35 = vector.multi_reduction <add>, %34, %cst_18 [0] : vector<16x32xf32> to vector<32xf32>
      %36 = vector.shape_cast %35 : vector<32xf32> to vector<1x32xf32>
      %37 = arith.addf %33, %36 : vector<1x32xf32>
      %c0_19 = arith.constant 0 : index
      %c0_20 = arith.constant 0 : index
      %38 = vector.load %arg9[%c0_19, %c0_20] : memref<1x32xf32, #tpu.memory_space<vmem>>, vector<1x32xf32>
      tpu.vector_store %arg9[%c0_19, %c0_20], %37 {strides = array<i32>} : memref<1x32xf32, #tpu.memory_space<vmem>>, vector<1x32xf32>,
      %c0_i32_21 = arith.constant 0 : i32
      %39 = arith.cmpi eq, %arg1, %c0_i32_21 : i32
      %40 = arith.extui %39 : i1 to i32
      %c0_i32_22 = arith.constant 0 : i32
      %41 = arith.cmpi ne, %40, %c0_i32_22 : i32
      scf.if %41 {
        %c0_23 = arith.constant 0 : index
        %42 = memref.load %arg2[%c0_23] : memref<1xi32, #tpu.memory_space<smem>>
        %43 = arith.sitofp %42 : i32 to f32
        %cst_24 = arith.constant 1.000000e+00 : f32
        %44 = arith.divf %cst_24, %43 : f32
        %c0_25 = arith.constant 0 : index
        %c0_26 = arith.constant 0 : index
        %45 = vector.load %arg8[%c0_25, %c0_26] : memref<1x32xf32, #tpu.memory_space<vmem>>, vector<1x32xf32>
        %46 = vector.broadcast %44 : f32 to vector<1x32xf32>
        %47 = arith.mulf %45, %46 : vector<1x32xf32>
        %c0_27 = arith.constant 0 : index
        %c0_28 = arith.constant 0 : index
        %48 = vector.load %arg9[%c0_27, %c0_28] : memref<1x32xf32, #tpu.memory_space<vmem>>, vector<1x32xf32>
        %49 = vector.broadcast %44 : f32 to vector<1x32xf32>
        %50 = arith.mulf %48, %49 : vector<1x32xf32>
        %51 = arith.mulf %47, %47 : vector<1x32xf32>
        %52 = arith.subf %50, %51 : vector<1x32xf32>
        %cst_29 = arith.constant 0.000000e+00 : f32
        %53 = vector.broadcast %cst_29 : f32 to vector<1x32xf32>
        %54 = arith.maximumf %52, %53 : vector<1x32xf32>
        %c0_30 = arith.constant 0 : index
        %c0_31 = arith.constant 0 : index
        %55 = vector.load %arg5[%c0_30, %c0_31] : memref<4x32xf32, #tpu.memory_space<vmem>>, vector<1x32xf32>
        %cst_32 = arith.constant 9.99999974E-6 : f32
        %56 = vector.broadcast %cst_32 : f32 to vector<1x32xf32>
        %57 = arith.addf %54, %56 : vector<1x32xf32>
        %58 = math.rsqrt %57 : vector<1x32xf32>
        %59 = arith.mulf %55, %58 : vector<1x32xf32>
        %c0_33 = arith.constant 0 : index
        %c0_34 = arith.constant 0 : index
        %60 = vector.load %arg10[%c0_33, %c0_34] : memref<2x32xf32, #tpu.memory_space<vmem>>, vector<1x32xf32>
        tpu.vector_store %arg10[%c0_33, %c0_34], %59 {strides = array<i32>} : memref<2x32xf32, #tpu.memory_space<vmem>>, vector<1x32xf32>,
        %c1 = arith.constant 1 : index
        %c0_35 = arith.constant 0 : index
        %61 = vector.load %arg5[%c1, %c0_35] : memref<4x32xf32, #tpu.memory_space<vmem>>, vector<1x32xf32>
        %62 = arith.mulf %47, %59 : vector<1x32xf32>
        %63 = arith.subf %61, %62 : vector<1x32xf32>
        %c1_36 = arith.constant 1 : index
        %c0_37 = arith.constant 0 : index
        %64 = vector.load %arg10[%c1_36, %c0_37] : memref<2x32xf32, #tpu.memory_space<vmem>>, vector<1x32xf32>
        tpu.vector_store %arg10[%c1_36, %c0_37], %63 {strides = array<i32>} : memref<2x32xf32, #tpu.memory_space<vmem>>, vector<1x32xf32>,
      } else {
      }
    } else {
    }
    %c1_i32 = arith.constant 1 : i32
    %3 = arith.cmpi eq, %arg0, %c1_i32 : i32
    %4 = arith.extui %3 : i1 to i32
    %c0_i32_1 = arith.constant 0 : i32
    %5 = arith.cmpi ne, %4, %c0_i32_1 : i32
    scf.if %5 {
      %6 = arith.index_cast %arg1 : i32 to index
      %c0 = arith.constant 0 : index
      %c0_2 = arith.constant 0 : index
      %7 = vector.load %arg7[%6, %c0, %c0_2] : memref<1x16x32xbf16, #tpu.memory_space<vmem>>, vector<1x16x32xbf16>
      %8 = vector.shape_cast %7 : vector<1x16x32xbf16> to vector<16x32xbf16>
      %9 = arith.extf %8 : vector<16x32xbf16> to vector<16x32xf32>
      %c0_3 = arith.constant 0 : index
      %c0_4 = arith.constant 0 : index
      %10 = vector.load %arg10[%c0_3, %c0_4] : memref<2x32xf32, #tpu.memory_space<vmem>>, vector<1x32xf32>
      %11 = vector.broadcast %10 : vector<1x32xf32> to vector<16x32xf32>
      %12 = arith.mulf %9, %11 : vector<16x32xf32>
      %c1 = arith.constant 1 : index
      %c0_5 = arith.constant 0 : index
      %13 = vector.load %arg10[%c1, %c0_5] : memref<2x32xf32, #tpu.memory_space<vmem>>, vector<1x32xf32>
      %14 = vector.broadcast %13 : vector<1x32xf32> to vector<16x32xf32>
      %15 = arith.addf %12, %14 : vector<16x32xf32>
      %cst = arith.constant 0.000000e+00 : f32
      %16 = vector.broadcast %cst : f32 to vector<16x32xf32>
      %17 = arith.maximumf %15, %16 : vector<16x32xf32>
      %c2 = arith.constant 2 : index
      %c0_6 = arith.constant 0 : index
      %18 = vector.load %arg5[%c2, %c0_6] : memref<4x32xf32, #tpu.memory_space<vmem>>, vector<1x32xf32>
      %cst_7 = arith.constant dense<0.000000e+00> : vector<1x16xf32>
      %19 = tpu.matmul %18, %17, %cst_7 {dimension_numbers = #tpu.dot_dimension_numbers<[1], [1], [0], [0], [0, 0, 1, 0], [], []>} : vector<1x32xf32>, vector<16x32xf32>, vector<1x16xf32> -> vector<1x16xf32>
      %c3 = arith.constant 3 : index
      %c0_8 = arith.constant 0 : index
      %20 = vector.load %arg5[%c3, %c0_8] : memref<4x32xf32, #tpu.memory_space<vmem>>, vector<1x1xf32>
      %21 = vector.broadcast %20 : vector<1x1xf32> to vector<1x16xf32>
      %22 = arith.addf %19, %21 : vector<1x16xf32>
      %cst_9 = arith.constant 5.000000e-01 : f32
      %23 = vector.broadcast %cst_9 : f32 to vector<1x16xf32>
      %24 = arith.mulf %23, %22 : vector<1x16xf32>
      %25 = math.tanh %24 : vector<1x16xf32>
      %cst_10 = arith.constant 1.000000e+00 : f32
      %26 = vector.broadcast %cst_10 : f32 to vector<1x16xf32>
      %27 = arith.addf %25, %26 : vector<1x16xf32>
      %cst_11 = arith.constant 5.000000e-01 : f32
      %28 = vector.broadcast %cst_11 : f32 to vector<1x16xf32>
      %29 = arith.mulf %28, %27 : vector<1x16xf32>
      %30 = vector.shape_cast %29 : vector<1x16xf32> to vector<1x1x16xf32>
      %c0_12 = arith.constant 0 : index
      %c0_13 = arith.constant 0 : index
      %c0_14 = arith.constant 0 : index
      %31 = vector.load %arg6[%c0_12, %c0_13, %c0_14] : memref<1x1x16xf32, #tpu.memory_space<vmem>>, vector<1x1x16xf32>
      tpu.vector_store %arg6[%c0_12, %c0_13, %c0_14], %30 {strides = array<i32>} : memref<1x1x16xf32, #tpu.memory_space<vmem>>, vector<1x1x16xf32>,
    } else {
    }
    return
  }
  func.func @transform_0(%arg0: i32, %arg1: i32, %arg2: memref<1xi32, #tpu.memory_space<smem>>) -> (i32, i32) {
    %c1_i32 = arith.constant 1 : i32
    %0 = arith.subi %c1_i32, %arg0 : i32
    %1 = arith.muli %arg1, %0 : i32
    %c0_i32 = arith.constant 0 : i32
    %2 = arith.muli %c0_i32, %arg0 : i32
    %3 = arith.addi %1, %2 : i32
    %c0_i32_0 = arith.constant 0 : i32
    %c0_i32_1 = arith.constant 0 : i32
    return %3, %c0_i32_0 : i32, i32
  }
  func.func @transform_1(%arg0: i32, %arg1: i32, %arg2: memref<1xi32, #tpu.memory_space<smem>>) -> (i32, i32) {
    %c0_i32 = arith.constant 0 : i32
    %c0_i32_0 = arith.constant 0 : i32
    %c0_i32_1 = arith.constant 0 : i32
    return %c0_i32, %c0_i32_0 : i32, i32
  }
  func.func @transform_2(%arg0: i32, %arg1: i32, %arg2: memref<1xi32, #tpu.memory_space<smem>>) -> (i32, i32) {
    %c0_i32 = arith.constant 0 : i32
    %c0_i32_0 = arith.constant 0 : i32
    %c0_i32_1 = arith.constant 0 : i32
    return %c0_i32, %c0_i32_0 : i32, i32
  }
  func.func @transform_3(%arg0: i32, %arg1: i32, %arg2: memref<1xi32, #tpu.memory_space<smem>>) -> (i32, i32, i32) {
    %0 = arith.muli %arg0, %arg1 : i32
    %c0_i32 = arith.constant 0 : i32
    %c0_i32_0 = arith.constant 0 : i32
    %c0_i32_1 = arith.constant 0 : i32
    return %0, %c0_i32, %c0_i32_0 : i32, i32, i32
  }
}

</mosaic_0001>

<bundles_post_ra>
// kernel: tpu_custom_call.1
= control target key start
LH: loop header
LB: loop body
LE: loop exit
PB: predicated region body
PF: predicated region fallthrough
CT: control target
= control target key end

     0   :  { %s907_s0 = inlined_call_operand.<no memory space> [shape: s32[1], index: 0, kind: input, shape index: {}]   ;;  %s908_s1 = inlined_call_operand.vmem [shape: f32[16,64], index: 1, kind: input, shape index: {}]   ;;  %s909_s2 = inlined_call_operand.vmem [shape: f32[64,32], index: 2, kind: input, shape index: {}]   ;;  %s910_s3 = inlined_call_operand.vmem [shape: f32[4,32], index: 3, kind: input, shape index: {}]   ;;  %s911_s4 = inlined_call_operand.hbm [shape: f32[1,1,16], index: 4, kind: output, shape index: {}]  }
   0x1   :  { %9 = sst [smem:[#allocation7]] %s907_s0 }
   0x2   :  { %10 = vsyncpa [#allocation9], 0 }
   0x3   :  { %12 = vsyncpa [#allocation9 + $0x1], 0  ;;  %s793_s17 = smov 0   ;;  %s795_s18 = smov 0  }
   0x4   :  { %s797_s19 = smov 0  }
   0x5 LB: > { %s577_s0 = sadd.s32 4294967295, %s757_s19   ;;  %s578_s20 = sadd.s32 4294967294, %s757_s19   ;;  %s757_s19 = sphi %s797_s19, %s18_s19   ;;  %s753_s18 = sphi %s795_s18, %s914_s18   ;;  %s749_s17 = sphi %s793_s17, %s913_s17  }
   0x6   : > { %s30_s21 = sadd.s32 1, %s753_s18  ;;  %p582_p0 = scmp.ge.s32.totalorder %s757_s19, 1 }
   0x7   : > { %p32_p1 = scmp.ge.s32.totalorder %s30_s21, 2  ;;  %p165_p2 = scmp.lt.s32.totalorder %s757_s19, 3 }
   0x9   : > { %s916_s21 = smov (%p32_p1, %s30_s21), 0  ;;  %p166_p3 = pnand %p582_p0, %p165_p2 }
   0xa   : > { %p583_p4 = scmp.ne.s32.totalorder (!%p166_p3), %s749_s17, 0 }
   0xb   : > { %169 = sbr.rel (%p166_p3) target bundleno = 579 (0x243), region = 32 }
  0x12   : > { %204 = sbr.rel (%p583_p4) target bundleno = 304 (0x130), region = 36  ;;  %v214_v0 = vld [vmem:[%s909_s2] sm:$0xff] (!%p583_p4)  ;;  %v215_v1 = vld [vmem:[%s909_s2 + $0x8] sm:$0xff] (!%p583_p4)  ;;  %v216_v2 = vld [vmem:[%s909_s2 + $0x10] sm:$0xff] (!%p583_p4)  ;;  %vm222_vm0 = vcmask (!%p583_p4), 523264   ;;  %s825_s28 = sld [smem:[#allocation7]] (!%p583_p4)  ;;  %v310_v17 = vlaneseq (!%p583_p4) }
  0x13   : > { %v635_v3 = vpack.c.bf16 (!%p583_p4), %v215_v1, %v214_v0  ;;  %v217_v4 = vld [vmem:[%s909_s2 + $0x18] sm:$0xff] (!%p583_p4)  ;;  %v218_v6 = vld [vmem:[%s909_s2 + $0x20] sm:$0xff] (!%p583_p4)  ;;  %v219_v7 = vld [vmem:[%s909_s2 + $0x28] sm:$0xff] (!%p583_p4)  ;;  %vm209_vm1 = vcmask (!%p583_p4), 253952   ;;  %v759_v16 = vmov (!%p583_p4), 0.0   ;;  %vm307_vm3 = vcmask (!%p583_p4), 261120  }
  0x14   : > { %v639_v5 = vpack.c.bf16 (!%p583_p4), %v217_v4, %v216_v2  ;;  %v212_v8 = vld [vmem:[%s908_s1] sm:$0xff] (!%p583_p4)  ;;  %v643_v9 = vpack.c.bf16 (!%p583_p4), %v219_v7, %v218_v6  ;;  %v220_v10 = vld [vmem:[%s909_s2 + $0x30] sm:$0xff] (!%p583_p4)  ;;  %v221_v11 = vld [vmem:[%s909_s2 + $0x38] sm:$0xff] (!%p583_p4)  ;;  %210 = vst.msk [vmem:[#allocation3] sm:$0x1] (!%p583_p4), %vm209_vm1, %v759_v16  ;;  %v311_v18 = vshrl.u32 (!%p583_p4), %v310_v17, 7 }
  0x15   : > { %636 = vmatprep.subr.bf16.mxu0 (!%p583_p4), %v635_v3  ;;  %625 = vmatprep.mubr.msk.f32.mxu0 (!%p583_p4), %vm222_vm0, %v212_v8  ;;  %v647_v13 = vpack.c.bf16 (!%p583_p4), %v221_v11, %v220_v10  ;;  %v213_v14 = vld [vmem:[%s908_s1 + $0x8] sm:$0xff] (!%p583_p4)  ;;  %211 = vst.msk [vmem:[#allocation4] sm:$0x1] (!%p583_p4), %vm209_vm1, %v759_v16  ;;  %v369_v59 = vld [vmem:[%s910_s3] sm:$0x1] (!%p583_p4) }
  0x16   : > { %638 = vmatpush3.bf16.msra.mxu0 (!%p583_p4), %v635_v3  ;;  %v312_v19 = vadd.s32 (!%p583_p4), 8, %v311_v18  ;;  %v374_v62 = vld [vmem:[%s910_s3 + $0x1] sm:$0x1] (!%p583_p4) }
  0x17   : > { %640 = vmatprep.subr.bf16.mxu0 (!%p583_p4), %v639_v5 }
  0x18   : > { %s357_s15 = scvt.s32.f32 (!%p583_p4), %s825_s28  ;;  %v317_v20 = vstv (!%p583_p4), %s825_s28 }
  0x19   : > { %vm319_vm2 = vcmp.lt.s32.totalorder %v312_v19, %v317_v20  ;;  %vm318_vm4 = vcmp.lt.s32.totalorder %v311_v18, %v317_v20 }
  0x1a   : > { %642 = vmatpush3.bf16.msra.mxu0 %v639_v5  ;;  %v358_v12 = vstv %s357_s15 }
  0x1b   : > { %644 = vmatprep.subr.bf16.mxu0 %v643_v9  ;;  %698 = vrcp.f32 %v358_v12  ;;  %v326_v43 = vld [vmem:[#allocation3] sm:$0x1] }
  0x1c   : > { %v339_v46 = vld [vmem:[#allocation4] sm:$0x1] }
  0x1e   : > { %646 = vmatpush3.bf16.msra.mxu0 %v643_v9 }
  0x1f   : > { %648 = vmatprep.subr.bf16.mxu0 %v647_v13 }
  0x22   : > { %650 = vmatpush3.bf16.msra.mxu0 %v647_v13 }
  0x25   : > { %v699_v15 = vpop.eup %698  ;;  %626 = vmatmul.mubr.msk.f32.vlgmr.msra.gmra.mrb[0].mxu0 %vm222_vm0, %v213_v14 }
  0x26   : > { %655 = vpush %v699_v15 }
  0x57   : > { %s656_s23 = spop %655 }
  0x58   : > { %v362_v50 = vstv %s656_s23 }
  0xf8   : > { %v627_v21 = vpop.f32.mrb[0].mxu0 }
  0xf9   : > { %v325_v22 = vsel %vm319_vm2, %v627_v21, 0.0  ;;  %v295_v23 = vpop.f32.mrb[1].mxu0 }
  0xfa   : > { %v328_v24 = vsel %vm307_vm3, %v325_v22, 0.0  ;;  %v341_v25 = vmul.f32 %v325_v22, %v325_v22  ;;  %v304_v26 = vpack.c.bf16 %v627_v21, %v295_v23  ;;  %v324_v27 = vsel %vm318_vm4, %v295_v23, 0.0 }
  0xfb   : > { %v327_v28 = vsel %vm307_vm3, %v324_v27, 0.0  ;;  %v340_v29 = vmul.f32 %v324_v27, %v324_v27 }
  0xfc   : > { %v343_v30 = vsel %vm307_vm3, %v341_v25, 0.0  ;;  %308 = vst.msk [vmem:[#allocation2] sm:$0xff] %vm307_vm3, %v304_v26  ;;  %v329_v31 = vadd.f32 %v328_v24, %v327_v28 }
  0xfd   : > { %v342_v32 = vsel %vm307_vm3, %v340_v29, 0.0 }
  0xfe   : > { %v330_v33 = vrot.slane %v329_v31, 4  ;;  %v344_v34 = vadd.f32 %v343_v30, %v342_v32 }
 0x100   : > { %v331_v35 = vadd.f32 %v330_v33, %v329_v31  ;;  %v345_v36 = vrot.slane %v344_v34, 4 }
 0x102   : > { %v332_v37 = vrot.slane %v331_v35, 2  ;;  %v346_v38 = vadd.f32 %v345_v36, %v344_v34 }
 0x104   : > { %v333_v39 = vadd.f32 %v332_v37, %v331_v35  ;;  %v347_v40 = vrot.slane %v346_v38, 2 }
 0x106   : > { %v334_v41 = vrot.slane %v333_v39, 1  ;;  %v348_v42 = vadd.f32 %v347_v40, %v346_v38 }
 0x108   : > { %v335_v44 = vadd.f32 %v334_v41, %v333_v39  ;;  %v349_v45 = vrot.slane %v348_v42, 1 }
 0x10a   : > { %v336_v47 = vadd.f32 %v335_v44, %v326_v43  ;;  %v350_v48 = vadd.f32 %v349_v45, %v348_v42 }
 0x10c   : > { %338 = vst.msk [vmem:[#allocation3] sm:$0x1] %vm209_vm1, %v336_v47  ;;  %v351_v49 = vadd.f32 %v350_v48, %v339_v46 }
 0x10e   : > { %352 = vst.msk [vmem:[#allocation4] sm:$0x1] %vm209_vm1, %v351_v49 }
 0x113   : > { %v361_v51 = vld [vmem:[#allocation3] sm:$0x1] }
 0x114   : > { %v363_v52 = vmul.f32 %v362_v50, %v361_v51 }
 0x115   : > { %v364_v53 = vld [vmem:[#allocation4] sm:$0x1] }
 0x116   : > { %v365_v54 = vmul.f32 %v364_v53, %v362_v50  ;;  %v366_v55 = vmul.f32 %v363_v52, %v363_v52 }
 0x118   : > { %v367_v56 = vsub.f32 %v365_v54, %v366_v55 }
 0x11a   : > { %v368_v57 = vmax.f32 %v367_v56, 0.0 }
 0x11c   : > { %v370_v58 = vadd.f32 1e-05, %v368_v57 }
 0x11e   : > { %700 = vrsqrt.f32 %v370_v58 }
 0x128   : > { %v701_v60 = vpop.eup %700 }
 0x129   : > { %v372_v61 = vmul.f32 %v701_v60, %v369_v59 }
 0x12b   : > { %373 = vst.msk [vmem:[#allocation5] sm:$0x1] %vm209_vm1, %v372_v61  ;;  %v375_v63 = vmul.f32 %v372_v61, %v363_v52 }
 0x12d   : > { %v376_v0 = vsub.f32 %v374_v62, %v375_v63 }
 0x12f   : > { %377 = vst.msk [vmem:[#allocation5 + $0x1] sm:$0x1] %vm209_vm1, %v376_v0 }
 0x130 PF: > { %p586_p5 = scmp.ne.s32.totalorder %s749_s17, 1 }
 0x131   : > { %v384_v1 = vld [vmem:[#allocation2] sm:$0xff] (!%p586_p5)  ;;  %v760_v3 = vmov (!%p586_p5), 0.0|0.0   ;;  %vm761_vm5 = vmmov (!%p586_p5), 0   ;;  %v762_v10 = vmov (!%p586_p5), 0.0   ;;  %v763_v11 = vmov (!%p586_p5), 0  }
 0x132   : > { %381 = sbr.rel (%p586_p5) target bundleno = 556 (0x22c), region = 48  ;;  %v587_v2 = vld [vmem:[#allocation5] ss:$0 sm:$0xff] (!%p586_p5)  ;;  %651 = vmatprep.subr.bf16.mxu0 (!%p586_p5), %v760_v3  ;;  %v385_v4 = vunpack.c.l.bf16 (!%p586_p5), %v384_v1  ;;  %v386_v5 = vunpack.c.h.bf16 (!%p586_p5), %v384_v1  ;;  %v404_v6 = vld [vmem:[%s910_s3 + $0x3] sm:$0x1] (!%p586_p5)  ;;  %632 = vmatprep.mubr.msk.f32.mxu0 (!%p586_p5), %vm761_vm5, %v762_v10  ;;  %vm410_vm6 = vcmask (!%p586_p5), 261120  }
 0x133   : > { %702 = vset.pattern.permute.xlu0 (!%p586_p5), %v763_v11  ;;  %vm653_vm7 = vmpackc.low (!%p586_p5), %vm410_vm6, %vm410_vm6  ;;  %v403_v17 = vld [vmem:[%s910_s3 + $0x2] sm:$0x1] (!%p586_p5)  ;;  %vm494_vm8 = vcmask (!%p586_p5), 122880  }
 0x134   : > { %v392_v8 = vmul.f32 (!%p586_p5), %v587_v2, %v385_v4  ;;  %v393_v9 = vmul.f32 (!%p586_p5), %v587_v2, %v386_v5  ;;  %407 = vperm.xlu0 (!%p586_p5), %702, %v404_v6  }
 0x136   : > { %v588_v7 = vld [vmem:[#allocation5 + $0x1] ss:$0 sm:$0xff] (!%p586_p5) }
 0x137   : > { %v399_v12 = vadd.f32 (!%p586_p5), %v588_v7, %v392_v8  ;;  %v400_v13 = vadd.f32 (!%p586_p5), %v588_v7, %v393_v9 }
 0x139   : > { %v401_v14 = vmax.f32 %v399_v12, 0.0  ;;  %v402_v15 = vmax.f32 %v400_v13, 0.0 }
 0x13b   : > { %v652_v16 = vpack.c.bf16 %v402_v15, %v401_v14 }
 0x13d   : > { %654 = vmatpush3.bf16.xpose.msk.msra.mxu0 %vm653_vm7, %v652_v16 }
 0x144   : > { %633 = vmatmul.mubr.msk.f32.vlgmr.msra.gmra.mrb[0].mxu0 %vm410_vm6, %v403_v17 }
 0x1b3   : > { %v408_v18 = vpop.permute.xlu0 %407 }
 0x217   : > { %v486_v19 = vpop.f32.mrb[0].mxu0 }
 0x218   : > { %v487_v20 = vadd.f32 %v486_v19, %v408_v18  ;;  %v634_v21 = vpop.f32.mrb[1].mxu0 }
 0x21a   : > { %v490_v22 = vmul.f32 0.5, %v487_v20 }
 0x21c   : > { %703 = vtanh.f32 %v490_v22 }
 0x226   : > { %v704_v23 = vpop.eup %703 }
 0x227   : > { %v492_v24 = vadd.f32 1.0, %v704_v23 }
 0x229   : > { %v493_v25 = vmul.f32 0.5, %v492_v24 }
 0x22b   : > { %495 = vst.msk [vmem:[#allocation8] sm:$0x1] %vm494_vm8, %v493_v25 }
 0x22c PF: > { %p873_p6 = scmp.eq.s32.totalorder %s577_s0, 1  ;;  %s764_s6 = smov [#allocation8]  }
 0x22d   : > { %s510_s7 = sshll.u32 %s764_s6, 4  ;;  %s511_s7 = int_to_ptr.vmem [resolvable:$true] %s510_s7 }
 0x22e   : > { %s705_s8 = scalar_lea.vmem %s511_s7, 16  ;;  %s711_s9 = scalar_lea.vmem %s511_s7, 32 }
 0x22f   : > { %p706_p7 = scmp.ne.s32.totalorder %s511_s7, %s705_s8  ;;  %p712_p10 = scmp.lt.s32.totalorder %s511_s7, %s511_s7 }
 0x230   : > { %p713_p11 = scmp.lt.s32.totalorder %s711_s9, %s705_s8 }
 0x231   : > { %p707_p8 = pnand %p706_p7, %p873_p6 }
 0x232   : > { %p714_p12 = por %p713_p11, %p712_p10 }
 0x233   : > { %p708_p9 = pneg %p707_p8 }
 0x235   : > { %p715_p13 = pnand %p714_p12, %p708_p9 }
 0x237   : > { %718 = shalt.err (!%p715_p13)
}
 0x238   : > { %s719_s11 = scalar_lea.hbm %s911_s4, 16 }
 0x239   : > { %p720_p0 = scmp.ne.s32.totalorder %s911_s4, %s719_s11  ;;  %p725_p3 = scmp.lt.u32.totalorder %s719_s11, %s911_s4 }
 0x23b   : > { %p721_p1 = pnand %p720_p0, %p873_p6 }
 0x23d   : > { %p722_p2 = pneg %p721_p1 }
 0x23f   : > { %p727_p4 = pnand %p725_p3, %p722_p2 }
 0x241   : > { %730 = shalt.err (!%p727_p4)
}
 0x242   : > { %658 = dma.vmem_to_hbm [thread:$0]  (%p873_p6), %s511_s7, 16, %s911_s4, [#allocation9]  }
 0x243 PF: > { %p666_p5 = scmp.ge.s32.totalorder %s757_s19, 2  ;;  %p667_p7 = scmp.eq.s32.totalorder %s578_s20, 1 }
 0x245   : > { %p662_p8 = pnand %p667_p7, %p666_p5 }
 0x247   : > { %744 = dma.done.wait (!%p662_p8), [#allocation9], 16  }
 0x248   : > { %746 = vsyncadd (!%p662_p8), [#allocation9], 4294967280  ;;  %s18_s19 = sadd.s32 1, %s757_s19   ;;  %s913_s17 = smov %s753_s18 }
 0x249   : > { %p15_p9 = scmp.ge.s32.totalorder %s18_s19, 4   ;;  %s914_s18 = smov %s916_s21 }
 0x24b   :  { %17 = sbr.rel (!%p15_p9) target bundleno = 5 (0x5), region = 85 }
 0x252   :  { %527 = vsyncpa [#allocation9], 1 }
 0x253   :  { %529 = vsyncpa [#allocation9 + $0x1], 1 }

</bundles_post_ra>
